<compile_context>
chip_gen: v6e
topology: v6e:2x2x1
jax: 0.10.0
libtpu: 0.0.40
codegen_flags: <defaults>
</compile_context>

<pallas_src>
import functools
import numpy as np
import jax
import jax.numpy as jnp
from jax import lax
from jax.experimental import pallas as pl
from jax.experimental.pallas import tpu as pltpu

_POOL_KS = (2, 3, 5, 6)          # MaxPool2d kernel==stride for layer1..layer4


# ----------------------------------------------------------------------------
# host-side constants (built once per (H, W), cached)
# ----------------------------------------------------------------------------
def _interp_matrix(out_size: int, in_size: int) -> np.ndarray:
    """Row-stochastic bilinear matrix matching F.interpolate(align_corners=False)."""
    scale = in_size / out_size
    i = np.arange(out_size, dtype=np.float64)
    src = np.maximum((i + 0.5) * scale - 0.5, 0.0)
    i0 = np.minimum(np.floor(src).astype(np.int64), in_size - 1)
    i1 = np.minimum(i0 + 1, in_size - 1)
    lam = src - i0
    m = np.zeros((out_size, in_size), np.float32)
    m[np.arange(out_size), i0] += (1.0 - lam).astype(np.float32)
    m[np.arange(out_size), i1] += lam.astype(np.float32)
    return m


@functools.lru_cache(maxsize=None)
def _spp_consts(H: int, W: int):
    """Compact constants.

    sel   (HW, NQ): one-hot; column (block b, corner m) selects the flat
                    position of that branch's pooled-window top-left corner.
    up    (NQ, HW): compact bilinear upsample; row (block b, corner m) holds
                    the interpolation weights of that corner over the H*W grid.
    bmask (4, NQ) : row b is 1 only on branch-b's column block.
    cmask (2, HW) : column masks for the dx=-1 / dx=+1 conv taps.
    """
    HW = H * W
    n_per = [(H // k) * (W // k) for k in _POOL_KS]
    NQ = ((sum(n_per) + 127) // 128) * 128          # lane-pad compact-q axis
    sel = np.zeros((HW, NQ), np.float32)
    up = np.zeros((NQ, HW), np.float32)
    bmask = np.zeros((4, NQ), np.float32)
    off = 0
    for b, k in enumerate(_POOL_KS):
        hp, wp = H // k, W // k
        # floor-division pooling: every selected window must be fully interior
        assert hp * k <= H and wp * k <= W
        Wh = _interp_matrix(H, hp)                  # (H, hp)
        Ww = _interp_matrix(W, wp)                  # (W, wp)
        n = hp * wp
        corners = ((k * np.arange(hp))[:, None] * W +
                   (k * np.arange(wp))[None, :]).reshape(-1)      # (n,)
        sel[corners, off + np.arange(n)] = 1.0
        up[off:off + n, :] = np.einsum('ri,cj->ijrc', Wh, Ww).reshape(n, HW)
        bmask[b, off:off + n] = 1.0
        off += n
    cols = np.arange(HW) % W
    cmask = np.ones((2, HW), np.float32)
    cmask[0, cols == 0] = 0.0          # dx = -1 tap: source column would be -1
    cmask[1, cols == W - 1] = 0.0      # dx = +1 tap: source column would be  W
    return sel, up, bmask, cmask, NQ


# ----------------------------------------------------------------------------
# fused kernel: pools -> 1x1 conv -> upsample -> concat -> 3x3 conv (per batch)
# ----------------------------------------------------------------------------
def _make_kernel(C: int, Cout: int, H: int, W: int):
    HW = H * W
    Cc = C + 4                         # cat channels: [layer1..4, x]

    def kernel(x_ref, scal_ref, sel_ref, up_ref, bmask_ref, cmask_ref,
               wstk_ref, outb_ref, out_ref):
        f32 = jnp.float32
        x = x_ref[0]                                   # (C, HW) flat layout

        # ---- 4 branches: separable k x k shift-max, then 1x1 conv on the VPU
        q_rows = []
        for k in _POOL_KS:
            Lr = HW - (k - 1)                          # row-max valid length
            rowm = x[:, 0:Lr]
            for dx in range(1, k):
                rowm = jnp.maximum(rowm, x[:, dx:dx + Lr])
            Lm = Lr - (k - 1) * W                      # col-max valid length
            wmax = rowm[:, 0:Lm]
            for dy in range(1, k):
                o = dy * W
                wmax = jnp.maximum(wmax, rowm[:, o:o + Lm])
            # shared 1x1 conv (C -> 1): VPU weighted sum of channel rows + bias
            q = wmax[0:1, :] * scal_ref[0]
            for c in range(1, C):
                q = q + wmax[c:c + 1, :] * scal_ref[c]
            q = q + scal_ref[C]
            q_rows.append(jnp.concatenate(
                [q, jnp.zeros((1, HW - Lm), f32)], axis=1))
        qfull = jnp.concatenate(q_rows, axis=0)        # (4, HW)

        # ---- gather pooled-corner q values of all 4 branches: one matmul ---
        qc = jnp.dot(qfull, sel_ref[...], preferred_element_type=f32)  # (4,NQ)
        qc = qc * bmask_ref[...]         # keep branch-b block in row b only

        # ---- bilinear upsample of all 4 branches: one compact matmul -------
        layers = jnp.dot(qc, up_ref[...], preferred_element_type=f32)  # (4,HW)

        # ---- concat [layer1..4, x] + 3x3 'same' conv as ONE deep matmul ----
        cat = jnp.concatenate([layers, x], axis=0)     # (Cc, HW)
        halo = jnp.zeros((Cc, W + 1), f32)
        buf = jnp.concatenate([halo, cat, halo], axis=1)   # (Cc, HW + 2W + 2)
        mask_l = cmask_ref[0:1, :]
        mask_r = cmask_ref[1:2, :]
        taps = []
        for dy in (-1, 0, 1):
            for dx in (-1, 0, 1):
                o = (W + 1) + dy * W + dx
                t = buf[:, o:o + HW]
                if dx == -1:
                    t = t * mask_l                     # zero wrapped left taps
                elif dx == 1:
                    t = t * mask_r                     # zero wrapped right taps
                taps.append(t)
        stacked = jnp.concatenate(taps, axis=0)        # (9*Cc, HW), K = 72
        out = jnp.dot(wstk_ref[...], stacked, preferred_element_type=f32)
        out_ref[0] = out + outb_ref[...]               # (Cout, HW) lane-dense

    return kernel


# ----------------------------------------------------------------------------
# forward wrapper
# ----------------------------------------------------------------------------
def spp_block_forward(x, params):
    N, C, H, W = x.shape
    Cout = params["out_b"].shape[0]
    HW = H * W

    sel_np, up_np, bmask_np, cmask_np, NQ = _spp_consts(H, W)

    # free reshape -- no padded HBM copy of x
    xf = x.reshape(N, C, HW).astype(jnp.float32)
    # [w1_0..w1_{C-1}, b1] as SMEM scalars for the VPU 1x1 conv
    scal = jnp.concatenate(
        [params["conv1_w"].reshape(C), params["conv1_b"].reshape(1)]
    ).astype(jnp.float32)
    # out_conv weights stacked tap-major to match the 9-slab contraction order
    wstk = jnp.transpose(params["out_w"], (0, 2, 3, 1)).reshape(
        Cout, 9 * (C + 4)).astype(jnp.float32)
    outb = params["out_b"].reshape(Cout, 1).astype(jnp.float32)

    kernel = _make_kernel(C, Cout, H, W)
    out = pl.pallas_call(
        kernel,
        out_shape=jax.ShapeDtypeStruct((N, Cout, HW), jnp.float32),
        grid=(N,),
        in_specs=[
            pl.BlockSpec((1, C, HW), lambda n: (n, 0, 0)),        # x (per batch)
            pl.BlockSpec(memory_space=pltpu.MemorySpace.SMEM),    # [w1..., b1]
            pl.BlockSpec((HW, NQ), lambda n: (0, 0)),             # corner gather
            pl.BlockSpec((NQ, HW), lambda n: (0, 0)),             # compact upsample
            pl.BlockSpec((4, NQ), lambda n: (0, 0)),              # branch block mask
            pl.BlockSpec((2, HW), lambda n: (0, 0)),              # conv column masks
            pl.BlockSpec((Cout, 9 * (C + 4)), lambda n: (0, 0)),  # stacked out_conv w
            pl.BlockSpec((Cout, 1), lambda n: (0, 0)),            # out_conv bias
        ],
        out_specs=pl.BlockSpec((1, Cout, HW), lambda n: (n, 0, 0)),
        compiler_params=pltpu.CompilerParams(
            dimension_semantics=("parallel",),
            vmem_limit_bytes=32 * 1024 * 1024),
    )(xf, scal, jnp.asarray(sel_np), jnp.asarray(up_np),
      jnp.asarray(bmask_np), jnp.asarray(cmask_np), wstk, outb)

    # free reshape back to NCHW (output is already compact -- nothing to strip)
    return out.reshape(N, Cout, H, W)


# ----------------------------------------------------------------------------
# pure-JAX reference (same math; convs / interpolation via lax, f32-exact)
# ----------------------------------------------------------------------------
def _reference(x, params):
    N, C, H, W = x.shape
    hi = lax.Precision.HIGHEST
    neg_inf = jnp.array(-jnp.inf, x.dtype)
    layers = []
    for k in _POOL_KS:
        pooled = lax.reduce_window(x, neg_inf, lax.max,
                                   (1, 1, k, k), (1, 1, k, k), 'VALID')
        q = lax.conv_general_dilated(pooled, params["conv1_w"], (1, 1),
                                     'VALID', precision=hi)
        q = q + params["conv1_b"].reshape(1, 1, 1, 1)
        hp, wp = q.shape[2], q.shape[3]
        wh = jnp.asarray(_interp_matrix(H, hp))
        ww = jnp.asarray(_interp_matrix(W, wp))
        layers.append(jnp.einsum('Hh,nchw,Ww->ncHW', wh, q, ww, precision=hi))
    cat = jnp.concatenate(layers + [x], axis=1)
    out = lax.conv_general_dilated(cat, params["out_w"], (1, 1),
                                   ((1, 1), (1, 1)), precision=hi)
    return out + params["out_b"].reshape(1, -1, 1, 1)


if __name__ == "__main__":
    key = jax.random.PRNGKey(0)
    kx, k1, k2, k3, k4 = jax.random.split(key, 5)

    N, C, H, W = 2, 4, 16, 16
    x = jax.random.normal(kx, (N, C, H, W), jnp.float32)
    params = {
        "conv1_w": jax.random.normal(k1, (1, C, 1, 1), jnp.float32) * 0.5,
        "conv1_b": jax.random.normal(k2, (1,), jnp.float32) * 0.1,
        "out_w": jax.random.normal(k3, (C, C + 4, 3, 3), jnp.float32) * 0.1,
        "out_b": jax.random.normal(k4, (C,), jnp.float32) * 0.1,
    }

    fwd = jax.jit(spp_block_forward)
    out = jax.block_until_ready(fwd(x, params))
    assert out.shape == (N, C, H, W), out.shape

    ref = jax.block_until_ready(_reference(x, params))
    np.testing.assert_allclose(np.asarray(out), np.asarray(ref),
                               rtol=1e-3, atol=1e-3)
    print("KERNEL_OK")
</pallas_src>

<mosaic_0001>
module attributes {stable_mosaic.version = 11 : i64} {
  func.func @kernel(%arg0: i32, %arg1: memref<1x4x256xf32, #tpu.memory_space<vmem>>, %arg2: memref<5xf32, #tpu.memory_space<smem>>, %arg3: memref<256x128xf32, #tpu.memory_space<vmem>>, %arg4: memref<128x256xf32, #tpu.memory_space<vmem>>, %arg5: memref<4x128xf32, #tpu.memory_space<vmem>>, %arg6: memref<2x256xf32, #tpu.memory_space<vmem>>, %arg7: memref<4x72xf32, #tpu.memory_space<vmem>>, %arg8: memref<4x1xf32, #tpu.memory_space<vmem>>, %arg9: memref<1x4x256xf32, #tpu.memory_space<vmem>>) attributes {dimension_semantics = [#tpu.dimension_semantics<parallel>], iteration_bounds = array<i64: 2>, scalar_prefetch = 0 : i64, scratch_operands = 0 : i64, tpu.core_type = #tpu.core_type<tc>, window_params = [{transform_indices = @transform_0, window_bounds = array<i64: 1, 4, 256>}, {transform_indices = @transform_1, window_bounds = array<i64: 5>}, {pipeline_mode = #tpu.pipeline_mode<synchronous>, transform_indices = @transform_2, window_bounds = array<i64: 256, 128>}, {pipeline_mode = #tpu.pipeline_mode<synchronous>, transform_indices = @transform_3, window_bounds = array<i64: 128, 256>}, {pipeline_mode = #tpu.pipeline_mode<synchronous>, transform_indices = @transform_4, window_bounds = array<i64: 4, 128>}, {pipeline_mode = #tpu.pipeline_mode<synchronous>, transform_indices = @transform_5, window_bounds = array<i64: 2, 256>}, {pipeline_mode = #tpu.pipeline_mode<synchronous>, transform_indices = @transform_6, window_bounds = array<i64: 4, 72>}, {pipeline_mode = #tpu.pipeline_mode<synchronous>, transform_indices = @transform_7, window_bounds = array<i64: 4, 1>}, {transform_indices = @transform_8, window_bounds = array<i64: 1, 4, 256>}]} {
    %c0 = arith.constant 0 : index
    %c0_0 = arith.constant 0 : index
    %c0_1 = arith.constant 0 : index
    %0 = vector.load %arg1[%c0, %c0_0, %c0_1] : memref<1x4x256xf32, #tpu.memory_space<vmem>>, vector<1x4x256xf32>
    %1 = vector.shape_cast %0 : vector<1x4x256xf32> to vector<4x256xf32>
    %2 = vector.extract_strided_slice %1 {offsets = [0, 0], sizes = [4, 255], strides = [1, 1]} : vector<4x256xf32> to vector<4x255xf32>
    %3 = vector.extract_strided_slice %1 {offsets = [0, 1], sizes = [4, 255], strides = [1, 1]} : vector<4x256xf32> to vector<4x255xf32>
    %4 = arith.maximumf %2, %3 : vector<4x255xf32>
    %5 = vector.extract_strided_slice %4 {offsets = [0, 0], sizes = [4, 239], strides = [1, 1]} : vector<4x255xf32> to vector<4x239xf32>
    %6 = vector.extract_strided_slice %4 {offsets = [0, 16], sizes = [4, 239], strides = [1, 1]} : vector<4x255xf32> to vector<4x239xf32>
    %7 = arith.maximumf %5, %6 : vector<4x239xf32>
    %8 = vector.extract_strided_slice %7 {offsets = [0, 0], sizes = [1, 239], strides = [1, 1]} : vector<4x239xf32> to vector<1x239xf32>
    %c0_2 = arith.constant 0 : index
    %9 = memref.load %arg2[%c0_2] : memref<5xf32, #tpu.memory_space<smem>>
    %10 = vector.broadcast %9 : f32 to vector<1x239xf32>
    %11 = arith.mulf %8, %10 : vector<1x239xf32>
    %12 = vector.extract_strided_slice %7 {offsets = [1, 0], sizes = [1, 239], strides = [1, 1]} : vector<4x239xf32> to vector<1x239xf32>
    %c1 = arith.constant 1 : index
    %13 = memref.load %arg2[%c1] : memref<5xf32, #tpu.memory_space<smem>>
    %14 = vector.broadcast %13 : f32 to vector<1x239xf32>
    %15 = arith.mulf %12, %14 : vector<1x239xf32>
    %16 = arith.addf %11, %15 : vector<1x239xf32>
    %17 = vector.extract_strided_slice %7 {offsets = [2, 0], sizes = [1, 239], strides = [1, 1]} : vector<4x239xf32> to vector<1x239xf32>
    %c2 = arith.constant 2 : index
    %18 = memref.load %arg2[%c2] : memref<5xf32, #tpu.memory_space<smem>>
    %19 = vector.broadcast %18 : f32 to vector<1x239xf32>
    %20 = arith.mulf %17, %19 : vector<1x239xf32>
    %21 = arith.addf %16, %20 : vector<1x239xf32>
    %22 = vector.extract_strided_slice %7 {offsets = [3, 0], sizes = [1, 239], strides = [1, 1]} : vector<4x239xf32> to vector<1x239xf32>
    %c3 = arith.constant 3 : index
    %23 = memref.load %arg2[%c3] : memref<5xf32, #tpu.memory_space<smem>>
    %24 = vector.broadcast %23 : f32 to vector<1x239xf32>
    %25 = arith.mulf %22, %24 : vector<1x239xf32>
    %26 = arith.addf %21, %25 : vector<1x239xf32>
    %c4 = arith.constant 4 : index
    %27 = memref.load %arg2[%c4] : memref<5xf32, #tpu.memory_space<smem>>
    %28 = vector.broadcast %27 : f32 to vector<1x239xf32>
    %29 = arith.addf %26, %28 : vector<1x239xf32>
    %cst = arith.constant 0.000000e+00 : f32
    %30 = vector.broadcast %cst : f32 to vector<1x17xf32>
    %31 = tpu.concatenate %29, %30 in 1 : vector<1x239xf32>, vector<1x17xf32> -> vector<1x256xf32>
    %32 = vector.extract_strided_slice %1 {offsets = [0, 0], sizes = [4, 254], strides = [1, 1]} : vector<4x256xf32> to vector<4x254xf32>
    %33 = vector.extract_strided_slice %1 {offsets = [0, 1], sizes = [4, 254], strides = [1, 1]} : vector<4x256xf32> to vector<4x254xf32>
    %34 = arith.maximumf %32, %33 : vector<4x254xf32>
    %35 = vector.extract_strided_slice %1 {offsets = [0, 2], sizes = [4, 254], strides = [1, 1]} : vector<4x256xf32> to vector<4x254xf32>
    %36 = arith.maximumf %34, %35 : vector<4x254xf32>
    %37 = vector.extract_strided_slice %36 {offsets = [0, 0], sizes = [4, 222], strides = [1, 1]} : vector<4x254xf32> to vector<4x222xf32>
    %38 = vector.extract_strided_slice %36 {offsets = [0, 16], sizes = [4, 222], strides = [1, 1]} : vector<4x254xf32> to vector<4x222xf32>
    %39 = arith.maximumf %37, %38 : vector<4x222xf32>
    %40 = vector.extract_strided_slice %36 {offsets = [0, 32], sizes = [4, 222], strides = [1, 1]} : vector<4x254xf32> to vector<4x222xf32>
    %41 = arith.maximumf %39, %40 : vector<4x222xf32>
    %42 = vector.extract_strided_slice %41 {offsets = [0, 0], sizes = [1, 222], strides = [1, 1]} : vector<4x222xf32> to vector<1x222xf32>
    %c0_3 = arith.constant 0 : index
    %43 = memref.load %arg2[%c0_3] : memref<5xf32, #tpu.memory_space<smem>>
    %44 = vector.broadcast %43 : f32 to vector<1x222xf32>
    %45 = arith.mulf %42, %44 : vector<1x222xf32>
    %46 = vector.extract_strided_slice %41 {offsets = [1, 0], sizes = [1, 222], strides = [1, 1]} : vector<4x222xf32> to vector<1x222xf32>
    %c1_4 = arith.constant 1 : index
    %47 = memref.load %arg2[%c1_4] : memref<5xf32, #tpu.memory_space<smem>>
    %48 = vector.broadcast %47 : f32 to vector<1x222xf32>
    %49 = arith.mulf %46, %48 : vector<1x222xf32>
    %50 = arith.addf %45, %49 : vector<1x222xf32>
    %51 = vector.extract_strided_slice %41 {offsets = [2, 0], sizes = [1, 222], strides = [1, 1]} : vector<4x222xf32> to vector<1x222xf32>
    %c2_5 = arith.constant 2 : index
    %52 = memref.load %arg2[%c2_5] : memref<5xf32, #tpu.memory_space<smem>>
    %53 = vector.broadcast %52 : f32 to vector<1x222xf32>
    %54 = arith.mulf %51, %53 : vector<1x222xf32>
    %55 = arith.addf %50, %54 : vector<1x222xf32>
    %56 = vector.extract_strided_slice %41 {offsets = [3, 0], sizes = [1, 222], strides = [1, 1]} : vector<4x222xf32> to vector<1x222xf32>
    %c3_6 = arith.constant 3 : index
    %57 = memref.load %arg2[%c3_6] : memref<5xf32, #tpu.memory_space<smem>>
    %58 = vector.broadcast %57 : f32 to vector<1x222xf32>
    %59 = arith.mulf %56, %58 : vector<1x222xf32>
    %60 = arith.addf %55, %59 : vector<1x222xf32>
    %c4_7 = arith.constant 4 : index
    %61 = memref.load %arg2[%c4_7] : memref<5xf32, #tpu.memory_space<smem>>
    %62 = vector.broadcast %61 : f32 to vector<1x222xf32>
    %63 = arith.addf %60, %62 : vector<1x222xf32>
    %cst_8 = arith.constant 0.000000e+00 : f32
    %64 = vector.broadcast %cst_8 : f32 to vector<1x34xf32>
    %65 = tpu.concatenate %63, %64 in 1 : vector<1x222xf32>, vector<1x34xf32> -> vector<1x256xf32>
    %66 = vector.extract_strided_slice %1 {offsets = [0, 0], sizes = [4, 252], strides = [1, 1]} : vector<4x256xf32> to vector<4x252xf32>
    %67 = vector.extract_strided_slice %1 {offsets = [0, 1], sizes = [4, 252], strides = [1, 1]} : vector<4x256xf32> to vector<4x252xf32>
    %68 = arith.maximumf %66, %67 : vector<4x252xf32>
    %69 = vector.extract_strided_slice %1 {offsets = [0, 2], sizes = [4, 252], strides = [1, 1]} : vector<4x256xf32> to vector<4x252xf32>
    %70 = arith.maximumf %68, %69 : vector<4x252xf32>
    %71 = vector.extract_strided_slice %1 {offsets = [0, 3], sizes = [4, 252], strides = [1, 1]} : vector<4x256xf32> to vector<4x252xf32>
    %72 = arith.maximumf %70, %71 : vector<4x252xf32>
    %73 = vector.extract_strided_slice %1 {offsets = [0, 4], sizes = [4, 252], strides = [1, 1]} : vector<4x256xf32> to vector<4x252xf32>
    %74 = arith.maximumf %72, %73 : vector<4x252xf32>
    %75 = vector.extract_strided_slice %74 {offsets = [0, 0], sizes = [4, 188], strides = [1, 1]} : vector<4x252xf32> to vector<4x188xf32>
    %76 = vector.extract_strided_slice %74 {offsets = [0, 16], sizes = [4, 188], strides = [1, 1]} : vector<4x252xf32> to vector<4x188xf32>
    %77 = arith.maximumf %75, %76 : vector<4x188xf32>
    %78 = vector.extract_strided_slice %74 {offsets = [0, 32], sizes = [4, 188], strides = [1, 1]} : vector<4x252xf32> to vector<4x188xf32>
    %79 = arith.maximumf %77, %78 : vector<4x188xf32>
    %80 = vector.extract_strided_slice %74 {offsets = [0, 48], sizes = [4, 188], strides = [1, 1]} : vector<4x252xf32> to vector<4x188xf32>
    %81 = arith.maximumf %79, %80 : vector<4x188xf32>
    %82 = vector.extract_strided_slice %74 {offsets = [0, 64], sizes = [4, 188], strides = [1, 1]} : vector<4x252xf32> to vector<4x188xf32>
    %83 = arith.maximumf %81, %82 : vector<4x188xf32>
    %84 = vector.extract_strided_slice %83 {offsets = [0, 0], sizes = [1, 188], strides = [1, 1]} : vector<4x188xf32> to vector<1x188xf32>
    %c0_9 = arith.constant 0 : index
    %85 = memref.load %arg2[%c0_9] : memref<5xf32, #tpu.memory_space<smem>>
    %86 = vector.broadcast %85 : f32 to vector<1x188xf32>
    %87 = arith.mulf %84, %86 : vector<1x188xf32>
    %88 = vector.extract_strided_slice %83 {offsets = [1, 0], sizes = [1, 188], strides = [1, 1]} : vector<4x188xf32> to vector<1x188xf32>
    %c1_10 = arith.constant 1 : index
    %89 = memref.load %arg2[%c1_10] : memref<5xf32, #tpu.memory_space<smem>>
    %90 = vector.broadcast %89 : f32 to vector<1x188xf32>
    %91 = arith.mulf %88, %90 : vector<1x188xf32>
    %92 = arith.addf %87, %91 : vector<1x188xf32>
    %93 = vector.extract_strided_slice %83 {offsets = [2, 0], sizes = [1, 188], strides = [1, 1]} : vector<4x188xf32> to vector<1x188xf32>
    %c2_11 = arith.constant 2 : index
    %94 = memref.load %arg2[%c2_11] : memref<5xf32, #tpu.memory_space<smem>>
    %95 = vector.broadcast %94 : f32 to vector<1x188xf32>
    %96 = arith.mulf %93, %95 : vector<1x188xf32>
    %97 = arith.addf %92, %96 : vector<1x188xf32>
    %98 = vector.extract_strided_slice %83 {offsets = [3, 0], sizes = [1, 188], strides = [1, 1]} : vector<4x188xf32> to vector<1x188xf32>
    %c3_12 = arith.constant 3 : index
    %99 = memref.load %arg2[%c3_12] : memref<5xf32, #tpu.memory_space<smem>>
    %100 = vector.broadcast %99 : f32 to vector<1x188xf32>
    %101 = arith.mulf %98, %100 : vector<1x188xf32>
    %102 = arith.addf %97, %101 : vector<1x188xf32>
    %c4_13 = arith.constant 4 : index
    %103 = memref.load %arg2[%c4_13] : memref<5xf32, #tpu.memory_space<smem>>
    %104 = vector.broadcast %103 : f32 to vector<1x188xf32>
    %105 = arith.addf %102, %104 : vector<1x188xf32>
    %cst_14 = arith.constant 0.000000e+00 : f32
    %106 = vector.broadcast %cst_14 : f32 to vector<1x68xf32>
    %107 = tpu.concatenate %105, %106 in 1 : vector<1x188xf32>, vector<1x68xf32> -> vector<1x256xf32>
    %108 = vector.extract_strided_slice %1 {offsets = [0, 0], sizes = [4, 251], strides = [1, 1]} : vector<4x256xf32> to vector<4x251xf32>
    %109 = vector.extract_strided_slice %1 {offsets = [0, 1], sizes = [4, 251], strides = [1, 1]} : vector<4x256xf32> to vector<4x251xf32>
    %110 = arith.maximumf %108, %109 : vector<4x251xf32>
    %111 = vector.extract_strided_slice %1 {offsets = [0, 2], sizes = [4, 251], strides = [1, 1]} : vector<4x256xf32> to vector<4x251xf32>
    %112 = arith.maximumf %110, %111 : vector<4x251xf32>
    %113 = vector.extract_strided_slice %1 {offsets = [0, 3], sizes = [4, 251], strides = [1, 1]} : vector<4x256xf32> to vector<4x251xf32>
    %114 = arith.maximumf %112, %113 : vector<4x251xf32>
    %115 = vector.extract_strided_slice %1 {offsets = [0, 4], sizes = [4, 251], strides = [1, 1]} : vector<4x256xf32> to vector<4x251xf32>
    %116 = arith.maximumf %114, %115 : vector<4x251xf32>
    %117 = vector.extract_strided_slice %1 {offsets = [0, 5], sizes = [4, 251], strides = [1, 1]} : vector<4x256xf32> to vector<4x251xf32>
    %118 = arith.maximumf %116, %117 : vector<4x251xf32>
    %119 = vector.extract_strided_slice %118 {offsets = [0, 0], sizes = [4, 171], strides = [1, 1]} : vector<4x251xf32> to vector<4x171xf32>
    %120 = vector.extract_strided_slice %118 {offsets = [0, 16], sizes = [4, 171], strides = [1, 1]} : vector<4x251xf32> to vector<4x171xf32>
    %121 = arith.maximumf %119, %120 : vector<4x171xf32>
    %122 = vector.extract_strided_slice %118 {offsets = [0, 32], sizes = [4, 171], strides = [1, 1]} : vector<4x251xf32> to vector<4x171xf32>
    %123 = arith.maximumf %121, %122 : vector<4x171xf32>
    %124 = vector.extract_strided_slice %118 {offsets = [0, 48], sizes = [4, 171], strides = [1, 1]} : vector<4x251xf32> to vector<4x171xf32>
    %125 = arith.maximumf %123, %124 : vector<4x171xf32>
    %126 = vector.extract_strided_slice %118 {offsets = [0, 64], sizes = [4, 171], strides = [1, 1]} : vector<4x251xf32> to vector<4x171xf32>
    %127 = arith.maximumf %125, %126 : vector<4x171xf32>
    %128 = vector.extract_strided_slice %118 {offsets = [0, 80], sizes = [4, 171], strides = [1, 1]} : vector<4x251xf32> to vector<4x171xf32>
    %129 = arith.maximumf %127, %128 : vector<4x171xf32>
    %130 = vector.extract_strided_slice %129 {offsets = [0, 0], sizes = [1, 171], strides = [1, 1]} : vector<4x171xf32> to vector<1x171xf32>
    %c0_15 = arith.constant 0 : index
    %131 = memref.load %arg2[%c0_15] : memref<5xf32, #tpu.memory_space<smem>>
    %132 = vector.broadcast %131 : f32 to vector<1x171xf32>
    %133 = arith.mulf %130, %132 : vector<1x171xf32>
    %134 = vector.extract_strided_slice %129 {offsets = [1, 0], sizes = [1, 171], strides = [1, 1]} : vector<4x171xf32> to vector<1x171xf32>
    %c1_16 = arith.constant 1 : index
    %135 = memref.load %arg2[%c1_16] : memref<5xf32, #tpu.memory_space<smem>>
    %136 = vector.broadcast %135 : f32 to vector<1x171xf32>
    %137 = arith.mulf %134, %136 : vector<1x171xf32>
    %138 = arith.addf %133, %137 : vector<1x171xf32>
    %139 = vector.extract_strided_slice %129 {offsets = [2, 0], sizes = [1, 171], strides = [1, 1]} : vector<4x171xf32> to vector<1x171xf32>
    %c2_17 = arith.constant 2 : index
    %140 = memref.load %arg2[%c2_17] : memref<5xf32, #tpu.memory_space<smem>>
    %141 = vector.broadcast %140 : f32 to vector<1x171xf32>
    %142 = arith.mulf %139, %141 : vector<1x171xf32>
    %143 = arith.addf %138, %142 : vector<1x171xf32>
    %144 = vector.extract_strided_slice %129 {offsets = [3, 0], sizes = [1, 171], strides = [1, 1]} : vector<4x171xf32> to vector<1x171xf32>
    %c3_18 = arith.constant 3 : index
    %145 = memref.load %arg2[%c3_18] : memref<5xf32, #tpu.memory_space<smem>>
    %146 = vector.broadcast %145 : f32 to vector<1x171xf32>
    %147 = arith.mulf %144, %146 : vector<1x171xf32>
    %148 = arith.addf %143, %147 : vector<1x171xf32>
    %c4_19 = arith.constant 4 : index
    %149 = memref.load %arg2[%c4_19] : memref<5xf32, #tpu.memory_space<smem>>
    %150 = vector.broadcast %149 : f32 to vector<1x171xf32>
    %151 = arith.addf %148, %150 : vector<1x171xf32>
    %cst_20 = arith.constant 0.000000e+00 : f32
    %152 = vector.broadcast %cst_20 : f32 to vector<1x85xf32>
    %153 = tpu.concatenate %151, %152 in 1 : vector<1x171xf32>, vector<1x85xf32> -> vector<1x256xf32>
    %154 = tpu.concatenate %31, %65, %107, %153 in 0 : vector<1x256xf32>, vector<1x256xf32>, vector<1x256xf32>, vector<1x256xf32> -> vector<4x256xf32>
    %c0_21 = arith.constant 0 : index
    %c0_22 = arith.constant 0 : index
    %155 = vector.load %arg3[%c0_21, %c0_22] : memref<256x128xf32, #tpu.memory_space<vmem>>, vector<256x128xf32>
    %cst_23 = arith.constant dense<0.000000e+00> : vector<4x128xf32>
    %156 = tpu.matmul %154, %155, %cst_23 {dimension_numbers = #tpu.dot_dimension_numbers<[1], [0], [0], [1], [0, 0, 1, 1], [], []>} : vector<4x256xf32>, vector<256x128xf32>, vector<4x128xf32> -> vector<4x128xf32>
    %c0_24 = arith.constant 0 : index
    %c0_25 = arith.constant 0 : index
    %157 = vector.load %arg5[%c0_24, %c0_25] : memref<4x128xf32, #tpu.memory_space<vmem>>, vector<4x128xf32>
    %158 = arith.mulf %156, %157 : vector<4x128xf32>
    %c0_26 = arith.constant 0 : index
    %c0_27 = arith.constant 0 : index
    %159 = vector.load %arg4[%c0_26, %c0_27] : memref<128x256xf32, #tpu.memory_space<vmem>>, vector<128x256xf32>
    %cst_28 = arith.constant dense<0.000000e+00> : vector<4x256xf32>
    %160 = tpu.matmul %158, %159, %cst_28 {dimension_numbers = #tpu.dot_dimension_numbers<[1], [0], [0], [1], [0, 0, 1, 1], [], []>} : vector<4x128xf32>, vector<128x256xf32>, vector<4x256xf32> -> vector<4x256xf32>
    %161 = tpu.concatenate %160, %1 in 0 : vector<4x256xf32>, vector<4x256xf32> -> vector<8x256xf32>
    %cst_29 = arith.constant 0.000000e+00 : f32
    %162 = vector.broadcast %cst_29 : f32 to vector<8x17xf32>
    %163 = tpu.concatenate %162, %161, %162 in 1 : vector<8x17xf32>, vector<8x256xf32>, vector<8x17xf32> -> vector<8x290xf32>
    %c0_30 = arith.constant 0 : index
    %c0_31 = arith.constant 0 : index
    %164 = vector.load %arg6[%c0_30, %c0_31] : memref<2x256xf32, #tpu.memory_space<vmem>>, vector<1x256xf32>
    %c1_32 = arith.constant 1 : index
    %c0_33 = arith.constant 0 : index
    %165 = vector.load %arg6[%c1_32, %c0_33] : memref<2x256xf32, #tpu.memory_space<vmem>>, vector<1x256xf32>
    %166 = vector.extract_strided_slice %163 {offsets = [0, 0], sizes = [8, 256], strides = [1, 1]} : vector<8x290xf32> to vector<8x256xf32>
    %167 = vector.broadcast %164 : vector<1x256xf32> to vector<8x256xf32>
    %168 = arith.mulf %166, %167 : vector<8x256xf32>
    %169 = vector.extract_strided_slice %163 {offsets = [0, 1], sizes = [8, 256], strides = [1, 1]} : vector<8x290xf32> to vector<8x256xf32>
    %170 = vector.extract_strided_slice %163 {offsets = [0, 2], sizes = [8, 256], strides = [1, 1]} : vector<8x290xf32> to vector<8x256xf32>
    %171 = vector.broadcast %165 : vector<1x256xf32> to vector<8x256xf32>
    %172 = arith.mulf %170, %171 : vector<8x256xf32>
    %173 = vector.extract_strided_slice %163 {offsets = [0, 16], sizes = [8, 256], strides = [1, 1]} : vector<8x290xf32> to vector<8x256xf32>
    %174 = vector.broadcast %164 : vector<1x256xf32> to vector<8x256xf32>
    %175 = arith.mulf %173, %174 : vector<8x256xf32>
    %176 = vector.extract_strided_slice %163 {offsets = [0, 17], sizes = [8, 256], strides = [1, 1]} : vector<8x290xf32> to vector<8x256xf32>
    %177 = vector.extract_strided_slice %163 {offsets = [0, 18], sizes = [8, 256], strides = [1, 1]} : vector<8x290xf32> to vector<8x256xf32>
    %178 = vector.broadcast %165 : vector<1x256xf32> to vector<8x256xf32>
    %179 = arith.mulf %177, %178 : vector<8x256xf32>
    %180 = vector.extract_strided_slice %163 {offsets = [0, 32], sizes = [8, 256], strides = [1, 1]} : vector<8x290xf32> to vector<8x256xf32>
    %181 = vector.broadcast %164 : vector<1x256xf32> to vector<8x256xf32>
    %182 = arith.mulf %180, %181 : vector<8x256xf32>
    %183 = vector.extract_strided_slice %163 {offsets = [0, 33], sizes = [8, 256], strides = [1, 1]} : vector<8x290xf32> to vector<8x256xf32>
    %184 = vector.extract_strided_slice %163 {offsets = [0, 34], sizes = [8, 256], strides = [1, 1]} : vector<8x290xf32> to vector<8x256xf32>
    %185 = vector.broadcast %165 : vector<1x256xf32> to vector<8x256xf32>
    %186 = arith.mulf %184, %185 : vector<8x256xf32>
    %187 = tpu.concatenate %168, %169, %172, %175, %176, %179, %182, %183, %186 in 0 : vector<8x256xf32>, vector<8x256xf32>, vector<8x256xf32>, vector<8x256xf32>, vector<8x256xf32>, vector<8x256xf32>, vector<8x256xf32>, vector<8x256xf32>, vector<8x256xf32> -> vector<72x256xf32>
    %c0_34 = arith.constant 0 : index
    %c0_35 = arith.constant 0 : index
    %188 = vector.load %arg7[%c0_34, %c0_35] : memref<4x72xf32, #tpu.memory_space<vmem>>, vector<4x72xf32>
    %cst_36 = arith.constant dense<0.000000e+00> : vector<4x256xf32>
    %189 = tpu.matmul %188, %187, %cst_36 {dimension_numbers = #tpu.dot_dimension_numbers<[1], [0], [0], [1], [0, 0, 1, 1], [], []>} : vector<4x72xf32>, vector<72x256xf32>, vector<4x256xf32> -> vector<4x256xf32>
    %c0_37 = arith.constant 0 : index
    %c0_38 = arith.constant 0 : index
    %190 = vector.load %arg8[%c0_37, %c0_38] : memref<4x1xf32, #tpu.memory_space<vmem>>, vector<4x1xf32>
    %191 = vector.broadcast %190 : vector<4x1xf32> to vector<4x256xf32>
    %192 = arith.addf %189, %191 : vector<4x256xf32>
    %c0_39 = arith.constant 0 : index
    %c0_40 = arith.constant 0 : index
    %c0_41 = arith.constant 0 : index
    %193 = vector.load %arg9[%c0_39, %c0_40, %c0_41] : memref<1x4x256xf32, #tpu.memory_space<vmem>>, vector<1x4x256xf32>
    %194 = vector.shape_cast %193 : vector<1x4x256xf32> to vector<4x256xf32>
    %195 = vector.shape_cast %192 : vector<4x256xf32> to vector<1x4x256xf32>
    tpu.vector_store %arg9[%c0_39, %c0_40, %c0_41], %195 {strides = array<i32>} : memref<1x4x256xf32, #tpu.memory_space<vmem>>, vector<1x4x256xf32>,
    return
  }
  func.func @transform_0(%arg0: i32) -> (i32, i32, i32) {
    %c0_i32 = arith.constant 0 : i32
    %c0_i32_0 = arith.constant 0 : i32
    %c0_i32_1 = arith.constant 0 : i32
    return %arg0, %c0_i32, %c0_i32_0 : i32, i32, i32
  }
  func.func @transform_1(%arg0: i32) -> i32 {
    %c0_i32 = arith.constant 0 : i32
    %c0_i32_0 = arith.constant 0 : i32
    return %c0_i32 : i32
  }
  func.func @transform_2(%arg0: i32) -> (i32, i32) {
    %c0_i32 = arith.constant 0 : i32
    %c0_i32_0 = arith.constant 0 : i32
    %c0_i32_1 = arith.constant 0 : i32
    return %c0_i32, %c0_i32_0 : i32, i32
  }
  func.func @transform_3(%arg0: i32) -> (i32, i32) {
    %c0_i32 = arith.constant 0 : i32
    %c0_i32_0 = arith.constant 0 : i32
    %c0_i32_1 = arith.constant 0 : i32
    return %c0_i32, %c0_i32_0 : i32, i32
  }
  func.func @transform_4(%arg0: i32) -> (i32, i32) {
    %c0_i32 = arith.constant 0 : i32
    %c0_i32_0 = arith.constant 0 : i32
    %c0_i32_1 = arith.constant 0 : i32
    return %c0_i32, %c0_i32_0 : i32, i32
  }
  func.func @transform_5(%arg0: i32) -> (i32, i32) {
    %c0_i32 = arith.constant 0 : i32
    %c0_i32_0 = arith.constant 0 : i32
    %c0_i32_1 = arith.constant 0 : i32
    return %c0_i32, %c0_i32_0 : i32, i32
  }
  func.func @transform_6(%arg0: i32) -> (i32, i32) {
    %c0_i32 = arith.constant 0 : i32
    %c0_i32_0 = arith.constant 0 : i32
    %c0_i32_1 = arith.constant 0 : i32
    return %c0_i32, %c0_i32_0 : i32, i32
  }
  func.func @transform_7(%arg0: i32) -> (i32, i32) {
    %c0_i32 = arith.constant 0 : i32
    %c0_i32_0 = arith.constant 0 : i32
    %c0_i32_1 = arith.constant 0 : i32
    return %c0_i32, %c0_i32_0 : i32, i32
  }
  func.func @transform_8(%arg0: i32) -> (i32, i32, i32) {
    %c0_i32 = arith.constant 0 : i32
    %c0_i32_0 = arith.constant 0 : i32
    %c0_i32_1 = arith.constant 0 : i32
    return %arg0, %c0_i32, %c0_i32_0 : i32, i32, i32
  }
}

</mosaic_0001>

<bundles_post_ra>
// kernel: spp_block_forward.1
= control target key start
LH: loop header
LB: loop body
LE: loop exit
PB: predicated region body
PF: predicated region fallthrough
CT: control target
= control target key end

     0   :  { %13 = vsyncpa [#allocation4], 0  ;;  %s1768_s0 = inlined_call_operand.vmem [shape: f32[2,4,256], index: 0, kind: input, shape index: {}]   ;;  %s1769_s1 = inlined_call_operand.vmem [shape: f32[5], index: 1, kind: input, shape index: {}]   ;;  %s1770_s2 = inlined_call_operand.hbm [shape: f32[256,128], index: 2, kind: input, shape index: {}]   ;;  %s1771_s3 = inlined_call_operand.vmem [shape: f32[128,256], index: 3, kind: input, shape index: {}]   ;;  %s1772_s4 = inlined_call_operand.vmem [shape: f32[4,128], index: 4, kind: input, shape index: {}]   ;;  %s1773_s5 = inlined_call_operand.vmem [shape: f32[2,256], index: 5, kind: input, shape index: {}]   ;;  %s1774_s6 = inlined_call_operand.vmem [shape: f32[4,72], index: 6, kind: input, shape index: {}]   ;;  %s1775_s7 = inlined_call_operand.vmem [shape: f32[4,1], index: 7, kind: input, shape index: {}]   ;;  %s1776_s8 = inlined_call_operand.vmem [shape: f32[2,4,256], index: 8, kind: output, shape index: {}]  }
   0x1   :  { %14 = vsyncpa [#allocation3], 0  ;;  %s1445_s27 = smov 0  }
   0x2 LB: > { %s1451_s28 = sadd.s32 4294967295, %s1372_s27   ;;  %p1193_p0 = scmp.ge.s32.totalorder %s1372_s27, 1  ;;  %s1372_s27 = sphi %s1445_s27, %s20_s27  }
   0x3   : > { %p224_p1 = scmp.lt.s32.totalorder %s1372_s27, 3  ;;  %p1777_p2 = scmp.eq.s32.totalorder %s1451_s28, 0 }
   0x4   : > { %s237_s9 = sshll.u32 %s1769_s1, 4  ;;  %s1374_s11 = smov [#allocation5]   ;;  %s238_s9 = int_to_ptr.vmem [resolvable:$true] %s237_s9 }
   0x5   : > { %p1459_p3 = pnand %p1193_p0, %p224_p1  ;;  %s247_s12 = sshll.u32 %s1374_s11, 4  ;;  %s248_s12 = int_to_ptr.vmem [resolvable:$true] %s247_s12 }
   0x6   : > { %s1317_s14 = scalar_lea.vmem %s238_s9, 16  ;;  %p1325_p10 = scmp.lt.s32.totalorder %s238_s9, %s238_s9 }
   0x7   : > { %s1779_s10 = scalar_select %p1459_p3, 1, 0 }
   0x8   : > { %p1269_p4 = pneg %p1459_p3  ;;  %p1318_p6 = scmp.ne.s32.totalorder %s238_s9, %s1317_s14 }
   0x9   : > { %p1326_p11 = scmp.lt.s32.totalorder %s1317_s14, %s1317_s14 }
   0xa   : > { %p1467_p5 = pnand %p1777_p2, %p1269_p4 }
   0xb   : > { %p1327_p12 = por %p1326_p11, %p1325_p10 }
   0xc   : > { %p1319_p7 = pneg %p1467_p5 }
   0xe   : > { %p1320_p8 = pnand %p1319_p7, %p1318_p6 }
  0x10   : > { %p1321_p9 = pneg %p1320_p8 }
  0x12   : > { %p1328_p13 = pnand %p1327_p12, %p1321_p9 }
  0x14   : > { %1331 = shalt.err (!%p1328_p13)
}
  0x15   : > { %s1375_s15 = smov [#allocation2]   ;;  %s1343_s16 = scalar_lea.vmem %s248_s12, 4096 }
  0x16   : > { %1272 = dma.vmem_to_smem (!%p1467_p5), %s238_s9, 16, %s1375_s15, [#allocation4]  }
  0x17   : > { %p1344_p0 = scmp.ne.s32.totalorder %s248_s12, %s1343_s16  ;;  %p1351_p2 = scmp.lt.s32.totalorder %s248_s12, %s248_s12 }
  0x18   : > { %p1352_p3 = scmp.lt.s32.totalorder %s1343_s16, %s1343_s16 }
  0x19   : > { %p1346_p1 = pnand %p1344_p0, %p1319_p7 }
  0x1a   : > { %p1353_p6 = por %p1352_p3, %p1351_p2 }
  0x1b   : > { %p1347_p4 = pneg %p1346_p1 }
  0x1d   : > { %p1354_p8 = pnand %p1353_p6, %p1347_p4 }
  0x1f   : > { %1357 = shalt.err (!%p1354_p8)
}
  0x20   : > { %s1376_s17 = smov 128   ;;  %s1377_s18 = smov 8  }
  0x21   : > { %1275 = dma.hbm_to_vmem [thread:$0]  (!%p1467_p5), %s1770_s2, 4096, %s248_s12, [#allocation3], %s1376_s17, %s1376_s17, %s1377_s18  }
  0x22   : > { %p1781_p9 = scmp.ne.s32.totalorder %s1779_s10, 0 }
  0x23   : > { %p1782_p10 = scmp.eq.s32.totalorder (!%p1781_p9), %s1451_s28, 0 }
  0x24   : > { %286 = sbr.rel (%p1781_p9) target bundleno = 1211 (0x4bb), region = 52 }
  0x29   : > { %1363 = dma.done.wait (%p1782_p10), [#allocation4], 16   ;;  %p1783_p7 = pmov %p1782_p10 }
  0x2b   : > { %1365 = vsyncadd (%p1783_p7), [#allocation4], 4294967280  ;;  %p1784_p2 = pmov %p1783_p7 }
  0x2d   : > { %1367 = dma.done.wait (%p1784_p2), [#allocation3], 4096   ;;  %p1785_p3 = pmov %p1784_p2 }
  0x2f   : > { %1369 = vsyncadd (%p1785_p3), [#allocation3], 4294963200 }
  0x30   : > { %296 = sfence }
  0x31   : > { %p325_p11 = scmp.lt.s32.totalorder %s1451_s28, 1  ;;  %s1378_s25 = smov 127   ;;  %vm340_vm0 = vcmask 1039360   ;;  %vm398_vm1 = vcmask 1031168   ;;  %vm451_vm2 = vcmask 1022976   ;;  %vm458_vm3 = vcmask 1014784  }
  0x32   : > { %s1379_s26 = smov 125   ;;  %s1380_s29 = smov 126   ;;  %v647_v16 = vld [vmem:[#allocation5 + $0xf8] sm:$0xff]  ;;  %vm524_vm4 = vcmask 1006592   ;;  %v646_v20 = vld [vmem:[#allocation5 + $0xf0] sm:$0xff]  ;;  %v645_v24 = vld [vmem:[#allocation5 + $0xe8] sm:$0xff] }
  0x33   : > { %s1787_s28 = smov (!%p325_p11, %s1451_s28), 1  ;;  %s1381_s30 = smov 124   ;;  %v631_v18 = vld [vmem:[#allocation5 + $0x78] sm:$0xff]  ;;  %1226 = vmatprep.subr.mxu0 %v647_v16  ;;  %v630_v22 = vld [vmem:[#allocation5 + $0x70] sm:$0xff]  ;;  %v629_v25 = vld [vmem:[#allocation5 + $0x68] sm:$0xff]  ;;  %vm348_vm5 = vcmask 916480  }
  0x34   : > { %s1224_s21 = sshll.u32 %s1787_s28, 3  ;;  %s1382_s9 = smov 123   ;;  %1227 = vmatpush3.msra.mxu0 %v631_v18  ;;  %v644_v27 = vld [vmem:[#allocation5 + $0xe0] sm:$0xff]  ;;  %v643_v29 = vld [vmem:[#allocation5 + $0xd8] sm:$0xff]  ;;  %v642_v31 = vld [vmem:[#allocation5 + $0xd0] sm:$0xff]  ;;  %vm412_vm6 = vcmask 785408  }
  0x35   : > { %s329_s24 = scalar_lea.vmem %s1768_s0, %s1224_s21  ;;  %s1383_s10 = smov 96   ;;  %1228 = vmatprep.subr.mxu0 %v646_v20  ;;  %v628_v28 = vld [vmem:[#allocation5 + $0x60] sm:$0xff]  ;;  %v627_v30 = vld [vmem:[#allocation5 + $0x58] sm:$0xff]  ;;  %v626_v32 = vld [vmem:[#allocation5 + $0x50] sm:$0xff]  ;;  %vm478_vm7 = vcmask 654336   ;;  %vm485_vm8 = vcmask 523264  }
  0x36   : > { %v1500_v0 = vld [vmem:[%s329_s24] sm:$0xff]  ;;  %s1384_s11 = smov 112   ;;  %s1385_s12 = smov 80   ;;  %1229 = vmatpush3.msra.mxu0 %v630_v22  ;;  %v641_v33 = vld [vmem:[#allocation5 + $0xc8] sm:$0xff]  ;;  %v639_v37 = vld [vmem:[#allocation5 + $0xb8] sm:$0xff]  ;;  %vm556_vm9 = vcmask 392192  }
  0x37   : > { %337 = vrot.lane.b32.xlu0 %v1500_v0, %s1378_s25  ;;  %448 = vrot.lane.b32.xlu1 %v1500_v0, %s1379_s26  ;;  %s1386_s13 = smov 64   ;;  %v625_v34 = vld [vmem:[#allocation5 + $0x48] sm:$0xff]  ;;  %v640_v35 = vld [vmem:[#allocation5 + $0xc0] sm:$0xff]  ;;  %s1387_s14 = smov 48   ;;  %v623_v38 = vld [vmem:[#allocation5 + $0x38] sm:$0xff]  ;;  %vm446_vm10 = vcmask 769024  }
  0x38   : > { %1230 = vmatprep.subr.mxu0 %v645_v24  ;;  %v624_v36 = vld [vmem:[#allocation5 + $0x40] sm:$0xff]  ;;  %v638_v39 = vld [vmem:[#allocation5 + $0xb0] sm:$0xff]  ;;  %v637_v41 = vld [vmem:[#allocation5 + $0xa8] sm:$0xff]  ;;  %s1204_s20 = sld [smem:[#allocation2 + $0x1]]  ;;  %vm519_vm11 = vcmask 490496   ;;  %vm393_vm12 = vcmask 908288  }
  0x39   : > { %1231 = vmatpush3.msra.mxu0 %v629_v25  ;;  %v622_v40 = vld [vmem:[#allocation5 + $0x30] sm:$0xff]  ;;  %v621_v42 = vld [vmem:[#allocation5 + $0x28] sm:$0xff]  ;;  %v636_v43 = vld [vmem:[#allocation5 + $0xa0] sm:$0xff]  ;;  %s352_s22 = sld [smem:[#allocation2]]  ;;  %vm607_vm13 = vcmask 1040384   ;;  %vm590_vm14 = vcmask 351232  }
  0x3a   : > { %1232 = vmatprep.subr.mxu0 %v644_v27  ;;  %v620_v44 = vld [vmem:[#allocation5 + $0x20] sm:$0xff]  ;;  %v635_v45 = vld [vmem:[#allocation5 + $0x98] sm:$0xff]  ;;  %v634_v47 = vld [vmem:[#allocation5 + $0x90] sm:$0xff]  ;;  %s1206_s23 = sld [smem:[#allocation2 + $0x2]]  ;;  %vm610_vm15 = vcmask 1041408   ;;  %s1391_s17 = smov 17  }
  0x3b   : > { %395 = vrot.lane.b32.xlu0 %v1500_v0, %s1380_s29  ;;  %455 = vrot.lane.b32.xlu1 %v1500_v0, %s1381_s30  ;;  %v619_v46 = vld [vmem:[#allocation5 + $0x18] sm:$0xff]  ;;  %v618_v48 = vld [vmem:[#allocation5 + $0x10] sm:$0xff]  ;;  %v633_v49 = vld [vmem:[#allocation5 + $0x88] sm:$0xff]  ;;  %s1208_s24 = sld [smem:[#allocation2 + $0x3]]  ;;  %s1392_s18 = smov 18  }
  0x3c   : > { %1233 = vmatpush3.msra.mxu0 %v628_v28  ;;  %v617_v50 = vld [vmem:[#allocation5 + $0x8] sm:$0xff]  ;;  %v751_v51 = vld [vmem:[%s1771_s3 + $0xf8] sm:$0xff]  ;;  %v750_v52 = vld [vmem:[%s1771_s3 + $0xf0] sm:$0xff]  ;;  %s1634_s26 = sld [smem:[#allocation2 + $0x4]]  ;;  %s1393_s19 = smov 16  }
  0x3d   : > { %1234 = vmatprep.subr.mxu0 %v643_v29  ;;  %v749_v53 = vld [vmem:[%s1771_s3 + $0xe8] sm:$0xff]  ;;  %v632_v54 = vld [vmem:[#allocation5 + $0x80] sm:$0xff]  ;;  %752 = vmatprep.subr.mxu1 %v751_v51  ;;  %v747_v57 = vld [vmem:[%s1771_s3 + $0xd8] sm:$0xff] }
  0x3e   : > { %1235 = vmatpush3.msra.mxu0 %v627_v30  ;;  %v748_v55 = vld [vmem:[%s1771_s3 + $0xe0] sm:$0xff]  ;;  %753 = vmatpush1.msra.mxu1 %v750_v52  ;;  %v746_v58 = vld [vmem:[%s1771_s3 + $0xd0] sm:$0xff]  ;;  %v745_v59 = vld [vmem:[%s1771_s3 + $0xc8] sm:$0xff]  ;;  %v1619_v27 = vstv %s1204_s20  ;;  %s1394_s20 = smov 2  }
  0x3f   : > { %521 = vrot.lane.b32.xlu0 %v1500_v0, %s1382_s9  ;;  %1236 = vmatprep.subr.mxu0 %v642_v31  ;;  %v616_v56 = vld [vmem:[#allocation5] sm:$0xff]  ;;  %v743_v61 = vld [vmem:[%s1771_s3 + $0xb8] sm:$0xff]  ;;  %v742_v62 = vld [vmem:[%s1771_s3 + $0xb0] sm:$0xff] }
  0x40   : > { %1237 = vmatpush3.msra.mxu0 %v626_v32  ;;  %754 = vmatprep.subr.mxu1 %v749_v53  ;;  %v744_v60 = vld [vmem:[%s1771_s3 + $0xc0] sm:$0xff]  ;;  %v741_v63 = vld [vmem:[%s1771_s3 + $0xa8] sm:$0xff]  ;;  %v727_v16 = vld [vmem:[%s1771_s3 + $0x38] sm:$0xff] }
  0x41   : > { %1238 = vmatprep.subr.mxu0 %v641_v33  ;;  %755 = vmatpush1.msra.mxu1 %v748_v55  ;;  %v372_v51 = vstv %s1208_s24  ;;  %s1397_s24 = smov 94  }
  0x42   : > { %1239 = vmatpush3.msra.mxu0 %v625_v34  ;;  %756 = vmatprep.subr.mxu1 %v747_v57 }
  0x43   : > { %1240 = vmatprep.subr.mxu0 %v640_v35  ;;  %757 = vmatpush1.msra.mxu1 %v746_v58 }
  0x44   : > { %1241 = vmatpush3.msra.mxu0 %v624_v36  ;;  %758 = vmatprep.subr.mxu1 %v745_v59  ;;  %v1624_v36 = vstv %s352_s22  ;;  %s1395_s22 = smov 111  }
  0x45   : > { %1242 = vmatprep.subr.mxu0 %v639_v37  ;;  %759 = vmatpush1.msra.mxu1 %v744_v60 }
  0x46   : > { %1243 = vmatpush3.msra.mxu0 %v623_v38  ;;  %760 = vmatprep.subr.mxu1 %v743_v61  ;;  %v364_v38 = vstv %s1206_s23  ;;  %s1396_s23 = smov 95  }
  0x47   : > { %1244 = vmatprep.subr.mxu0 %v638_v39  ;;  %761 = vmatpush1.msra.mxu1 %v742_v62 }
  0x48   : > { %1245 = vmatpush3.msra.mxu0 %v622_v40  ;;  %762 = vmatprep.subr.mxu1 %v741_v63 }
  0x49   : > { %1246 = vmatprep.subr.mxu0 %v637_v41 }
  0x4a   : > { %1247 = vmatpush3.msra.mxu0 %v621_v42 }
  0x4b   : > { %1248 = vmatprep.subr.mxu0 %v636_v43 }
  0x4c   : > { %1249 = vmatpush3.msra.mxu0 %v620_v44 }
  0x4d   : > { %1250 = vmatprep.subr.mxu0 %v635_v45 }
  0x4e   : > { %1251 = vmatpush3.msra.mxu0 %v619_v46 }
  0x4f   : > { %1252 = vmatprep.subr.mxu0 %v634_v47 }
  0x50   : > { %1253 = vmatpush3.msra.mxu0 %v618_v48 }
  0x51   : > { %1254 = vmatprep.subr.mxu0 %v633_v49 }
  0x52   : > { %1255 = vmatpush3.msra.mxu0 %v617_v50 }
  0x53   : > { %1256 = vmatprep.subr.mxu0 %v632_v54 }
  0x54   : > { %1257 = vmatpush3.msra.mxu0 %v616_v56 }
  0xa9   : > { %v338_v1 = vpop.permute.xlu0 %337  ;;  %v449_v2 = vpop.permute.xlu1 %448 }
  0xaa   : > { %v339_v3 = vrot.slane %v338_v1, 4  ;;  %v450_v7 = vrot.slane %v449_v2, 4 }
  0xac   : > { %v341_v4 = vsel %vm340_vm0, %v338_v1, %v339_v3  ;;  %v452_v14 = vsel %vm451_vm2, %v449_v2, %v450_v7  ;;  %v740_v1 = vld [vmem:[%s1771_s3 + $0xa0] sm:$0xff]  ;;  %v739_v2 = vld [vmem:[%s1771_s3 + $0x98] sm:$0xff]  ;;  %v738_v3 = vld [vmem:[%s1771_s3 + $0x90] sm:$0xff]  ;;  %vm613_vm2 = vcmask 1042432  }
  0xad   : > { %v396_v5 = vpop.permute.xlu0 %395  ;;  %v456_v6 = vpop.permute.xlu1 %455  ;;  %v1511_v9 = vmax.f32 %v1500_v0, %v341_v4  ;;  %763 = vmatpush1.msra.mxu1 %v740_v1  ;;  %v737_v4 = vld [vmem:[%s1771_s3 + $0x88] sm:$0xff]  ;;  %v734_v7 = vld [vmem:[%s1771_s3 + $0x70] sm:$0xff] }
  0xae   : > { %v397_v8 = vrot.slane %v396_v5, 4  ;;  %v457_v11 = vrot.slane %v456_v6, 4  ;;  %764 = vmatprep.subr.mxu1 %v739_v2 }
  0xaf   : > { %765 = vmatpush1.msra.mxu1 %v738_v3 }
  0xb0   : > { %v399_v10 = vsel %vm398_vm1, %v396_v5, %v397_v8  ;;  %v459_v19 = vsel %vm458_vm3, %v456_v6, %v457_v11  ;;  %v736_v5 = vld [vmem:[%s1771_s3 + $0x80] sm:$0xff]  ;;  %v735_v6 = vld [vmem:[%s1771_s3 + $0x78] sm:$0xff]  ;;  %766 = vmatprep.subr.mxu1 %v737_v4  ;;  %v733_v8 = vld [vmem:[%s1771_s3 + $0x68] sm:$0xff]  ;;  %vm825_vm3 = vcmask 1043456  }
  0xb1   : > { %v1515_v12 = vmax.f32 %v1511_v9, %v399_v10  ;;  %v522_v13 = vpop.permute.xlu0 %521  ;;  %767 = vmatpush1.msra.mxu1 %v736_v5  ;;  %v732_v10 = vld [vmem:[%s1771_s3 + $0x60] sm:$0xff]  ;;  %v731_v11 = vld [vmem:[%s1771_s3 + $0x58] sm:$0xff]  ;;  %v383_v5 = vlaneseq }
  0xb2   : > { %v523_v15 = vrot.slane %v522_v13, 4  ;;  %768 = vmatprep.subr.mxu1 %v735_v6 }
  0xb3   : > { %v454_v17 = vmax.f32 %v1515_v12, %v452_v14  ;;  %409 = vrot.lane.b32.xlu0 %v1515_v12, %s1383_s10  ;;  %403 = vrot.lane.b32.xlu1 %v1515_v12, %s1384_s11  ;;  %v729_v14 = vld [vmem:[%s1771_s3 + $0x48] sm:$0xff] }
  0xb4   : > { %v525_v23 = vsel %vm524_vm4, %v522_v13, %v523_v15  ;;  %769 = vmatpush1.msra.mxu1 %v734_v7  ;;  %v730_v13 = vld [vmem:[%s1771_s3 + $0x50] sm:$0xff]  ;;  %v728_v15 = vld [vmem:[%s1771_s3 + $0x40] sm:$0xff]  ;;  %vm834_vm4 = vcmask 138240  }
  0xb5   : > { %v1522_v21 = vmax.f32 %v454_v17, %v459_v19  ;;  %770 = vmatprep.subr.mxu1 %v733_v8 }
  0xb6   : > { %771 = vmatpush1.msra.mxu1 %v732_v10 }
  0xb7   : > { %475 = vrot.lane.b32.xlu1 %v1522_v21, %s1385_s12  ;;  %463 = vrot.lane.b32.xlu0 %v1522_v21, %s1384_s11  ;;  %v1528_v26 = vmax.f32 %v1522_v21, %v525_v23 }
  0xb8   : > { %772 = vmatprep.subr.mxu1 %v731_v11 }
  0xb9   : > { %773 = vmatpush1.msra.mxu1 %v730_v13 }
  0xba   : > { %774 = vmatprep.subr.mxu1 %v729_v14 }
  0xbb   : > { %469 = vrot.lane.b32.xlu0 %v1522_v21, %s1383_s10  ;;  %529 = vrot.lane.b32.xlu1 %v1528_v26, %s1384_s11 }
  0xbc   : > { %775 = vmatpush1.msra.mxu1 %v728_v15 }
  0xbd   : > { %776 = vmatprep.subr.mxu1 %v727_v16 }
  0xbf   : > { %482 = vrot.lane.b32.xlu0 %v1522_v21, %s1386_s13  ;;  %535 = vrot.lane.b32.xlu1 %v1528_v26, %s1383_s10 }
  0xc3   : > { %541 = vrot.lane.b32.xlu0 %v1528_v26, %s1385_s12  ;;  %547 = vrot.lane.b32.xlu1 %v1528_v26, %s1386_s13  ;;  %s1389_s13 = smov 34   ;;  %s334_s12 = scalar_lea.vmem %s1776_s8, %s1224_s21 }
  0xc7   : > { %553 = vrot.lane.b32.xlu0 %v1528_v26, %s1387_s14  ;;  %345 = vrot.lane.b32.xlu1 %v1511_v9, %s1384_s11  ;;  %s1390_s14 = smov 32  }
 0x125   : > { %v404_v17 = vpop.permute.xlu1 %403  ;;  %v410_v18 = vpop.permute.xlu0 %409 }
 0x126   : > { %v405_v19 = vrot.slane %v404_v17, 4  ;;  %v411_v20 = vrot.slane %v410_v18, 4 }
 0x128   : > { %v406_v22 = vsel %vm348_vm5, %v404_v17, %v405_v19  ;;  %v413_v28 = vsel %vm412_vm6, %v410_v18, %v411_v20 }
 0x129   : > { %v408_v23 = vmax.f32 %v1515_v12, %v406_v22  ;;  %v476_v24 = vpop.permute.xlu1 %475  ;;  %v464_v25 = vpop.permute.xlu0 %463 }
 0x12a   : > { %v465_v29 = vrot.slane %v464_v25, 4  ;;  %v477_v33 = vrot.slane %v476_v24, 4 }
 0x12b   : > { %v415_v30 = vmax.f32 %v408_v23, %v413_v28 }
 0x12c   : > { %v466_v31 = vsel %vm348_vm5, %v464_v25, %v465_v29  ;;  %v479_v43 = vsel %vm478_vm7, %v476_v24, %v477_v33  ;;  %v1641_v24 = vshrl.u32 %v383_v5, 7 }
 0x12d   : > { %v417_v32 = vmul.f32 %v415_v30, %v1619_v27  ;;  %v530_v34 = vpop.permute.xlu1 %529  ;;  %v470_v35 = vpop.permute.xlu0 %469  ;;  %v468_v39 = vmax.f32 %v1522_v21, %v466_v31  ;;  %v416_v42 = vmul.f32 %v415_v30, %v1624_v36  ;;  %v423_v47 = vmul.f32 %v415_v30, %v364_v38 }
 0x12e   : > { %v531_v12 = vrot.slane %v530_v34, 4  ;;  %v471_v37 = vrot.slane %v470_v35, 4  ;;  %v429_v60 = vmul.f32 %v415_v30, %v372_v51  ;;  %v380_v30 = vstv %s1634_s26  ;;  %s1398_s26 = smov 110  }
 0x12f   : > { %v1211_v40 = vrot.slane %v417_v32, 9  ;;  %v1212_v59 = vrot.slane %v423_v47, 10  ;;  %v1651_v47 = vsub.s32 0, %v1641_v24 }
 0x130   : > { %v472_v41 = vsel %vm412_vm6, %v470_v35, %v471_v37  ;;  %v532_v48 = vsel %vm348_vm5, %v530_v34, %v531_v12  ;;  %v1213_v11 = vrot.slane %v429_v60, 11  ;;  %v389_v12 = vsub.s32 4, %v1641_v24 }
 0x131   : > { %v474_v44 = vmax.f32 %v468_v39, %v472_v41  ;;  %v536_v45 = vpop.permute.xlu1 %535  ;;  %v483_v46 = vpop.permute.xlu0 %482  ;;  %v422_v53 = vadd.f32 %v1211_v40, %v416_v42  ;;  %v534_v55 = vmax.f32 %v1528_v26, %v532_v48 }
 0x132   : > { %v537_v49 = vrot.slane %v536_v45, 4  ;;  %v484_v50 = vrot.slane %v483_v46, 4 }
 0x133   : > { %v481_v52 = vmax.f32 %v474_v44, %v479_v43  ;;  %v428_v3 = vadd.f32 %v1212_v59, %v422_v53 }
 0x134   : > { %v538_v21 = vsel %vm412_vm6, %v536_v45, %v537_v49  ;;  %v486_v54 = vsel %vm485_vm8, %v483_v46, %v484_v50 }
 0x135   : > { %v488_v56 = vmax.f32 %v481_v52, %v486_v54  ;;  %v548_v57 = vpop.permute.xlu1 %547  ;;  %v542_v58 = vpop.permute.xlu0 %541  ;;  %v540_v63 = vmax.f32 %v534_v55, %v538_v21  ;;  %v434_v20 = vadd.f32 %v1213_v11, %v428_v3 }
 0x136   : > { %v549_v61 = vrot.slane %v548_v57, 4  ;;  %v543_v62 = vrot.slane %v542_v58, 4 }
 0x137   : > { %v490_v1 = vmul.f32 %v488_v56, %v1619_v27  ;;  %v496_v2 = vmul.f32 %v488_v56, %v364_v38  ;;  %v489_v6 = vmul.f32 %v488_v56, %v1624_v36  ;;  %v502_v18 = vmul.f32 %v488_v56, %v372_v51 }
 0x138   : > { %v544_v4 = vsel %vm478_vm7, %v542_v58, %v543_v62  ;;  %v550_v13 = vsel %vm485_vm8, %v548_v57, %v549_v61  ;;  %v435_v37 = vadd.f32 %v434_v20, %v380_v30  ;;  %v723_v20 = vld [vmem:[%s1771_s3 + $0x18] sm:$0xff]  ;;  %vm918_vm7 = vcmask 277504  }
 0x139   : > { %v1214_v26 = vrot.slane %v490_v1, 9  ;;  %v546_v7 = vmax.f32 %v540_v63, %v544_v4  ;;  %v346_v8 = vpop.permute.xlu1 %345  ;;  %v554_v10 = vpop.permute.xlu0 %553  ;;  %v1215_v17 = vrot.slane %v496_v2, 10  ;;  %v1216_v31 = vrot.slane %v502_v18, 11  ;;  %v725_v18 = vld [vmem:[%s1771_s3 + $0x28] sm:$0xff] }
 0x13a   : > { %v347_v14 = vrot.slane %v346_v8, 4  ;;  %v555_v15 = vrot.slane %v554_v10, 4  ;;  %v444_v52 = vrot.slane %v435_v37, %v389_v12  ;;  %vm906_vm8 = vcmask 261120  }
 0x13b   : > { %v495_v16 = vadd.f32 %v1214_v26, %v489_v6  ;;  %v552_v19 = vmax.f32 %v546_v7, %v550_v13 }
 0x13c   : > { %v349_v22 = vsel %vm348_vm5, %v346_v8, %v347_v14  ;;  %v557_v23 = vsel %vm556_vm9, %v554_v10, %v555_v15  ;;  %v447_v57 = vsel %vm446_vm10, %v444_v52, 0.0  ;;  %vm894_vm9 = vcmask 146432  }
 0x13d   : > { %v501_v25 = vadd.f32 %v1215_v17, %v495_v16  ;;  %v351_v28 = vmax.f32 %v1511_v9, %v349_v22  ;;  %v559_v29 = vmax.f32 %v552_v19, %v557_v23  ;;  %v594_v2 = vrot.slane %v447_v57, 7  ;;  %v726_v17 = vld [vmem:[%s1771_s3 + $0x30] sm:$0xff]  ;;  %v724_v19 = vld [vmem:[%s1771_s3 + $0x20] sm:$0xff]  ;;  %v721_v23 = vld [vmem:[%s1771_s3 + $0x8] sm:$0xff] }
 0x13e   : > { %777 = vmatpush1.msra.mxu1 %v726_v17  ;;  %v722_v22 = vld [vmem:[%s1771_s3 + $0x10] sm:$0xff] }
 0x13f   : > { %v357_v32 = vmul.f32 %v1619_v27, %v351_v28  ;;  %v365_v33 = vmul.f32 %v364_v38, %v351_v28  ;;  %v561_v34 = vmul.f32 %v559_v29, %v1619_v27  ;;  %v567_v35 = vmul.f32 %v559_v29, %v364_v38  ;;  %778 = vmatprep.subr.mxu1 %v725_v18 }
 0x140   : > { %v354_v39 = vmul.f32 %v1624_v36, %v351_v28  ;;  %v373_v41 = vmul.f32 %v372_v51, %v351_v28  ;;  %v507_v42 = vadd.f32 %v1216_v31, %v501_v25  ;;  %v560_v43 = vmul.f32 %v559_v29, %v1624_v36  ;;  %779 = vmatpush1.msra.mxu1 %v724_v19  ;;  %v720_v25 = vld [vmem:[%s1771_s3] sm:$0xff] }
 0x141   : > { %v1205_v40 = vrot.slane %v357_v32, 9  ;;  %v1217_v9 = vrot.slane %v561_v34, 9  ;;  %v573_v44 = vmul.f32 %v559_v29, %v372_v51  ;;  %v1207_v46 = vrot.slane %v365_v33, 10  ;;  %780 = vmatprep.subr.mxu1 %v723_v20  ;;  %v1220_v29 = vld [vmem:[%s1773_s5 + $0x1] ss:$2 sm:$0x3] }
 0x142   : > { %v508_v48 = vadd.f32 %v507_v42, %v380_v30  ;;  %v1218_v38 = vrot.slane %v567_v35, 10  ;;  %v1209_v50 = vrot.slane %v373_v41, 11  ;;  %v440_v36 = vrot.slane %v435_v37, %v1651_v47  ;;  %781 = vmatpush1.msra.mxu1 %v722_v22  ;;  %v841_v32 = vld [vmem:[%s1773_s5] ss:$2 sm:$0x3] }
 0x143   : > { %v362_v45 = vadd.f32 %v1205_v40, %v354_v39  ;;  %v566_v27 = vadd.f32 %v1217_v9, %v560_v43  ;;  %v1219_v53 = vrot.slane %v573_v44, 11  ;;  %782 = vmatprep.subr.mxu1 %v721_v23  ;;  %v1388_v28 = vmov 0.0   ;;  %v718_v37 = vld [vmem:[%s1772_s4] sm:$0xf] }
 0x144   : > { %v517_v21 = vrot.slane %v508_v48, %v389_v12  ;;  %v513_v58 = vrot.slane %v508_v48, %v1651_v47  ;;  %v593_v63 = vrot.slane %v440_v36, 7  ;;  %816 = vmatprep.mubr.f32.mxu1 %v1388_v28  ;;  %783 = vmatpush1.msra.mxu1 %v720_v25  ;;  %v861_v31 = vrot.slane %v1220_v29, %v1651_v47 }
 0x145   : > { %v370_v49 = vadd.f32 %v1207_v46, %v362_v45  ;;  %v572_v54 = vadd.f32 %v1218_v38, %v566_v27  ;;  %v1689_v34 = vrot.slane %v841_v32, %v1651_v47  ;;  %v823_v41 = vcombine.low %v1500_v0, %v1500_v0 }
 0x146   : > { %v520_v59 = vsel %vm519_vm11, %v517_v21, 0.0  ;;  %v598_v6 = vrot.slane %v513_v58, 6  ;;  %914 = vrot.lane.b32.xlu1 %v861_v31, %s1389_s13  ;;  %vm882_vm11 = vcmask 130048  }
 0x147   : > { %v378_v55 = vadd.f32 %v1209_v50, %v370_v49  ;;  %v578_v51 = vadd.f32 %v1219_v53, %v572_v54  ;;  %v599_v5 = vrot.slane %v520_v59, 6 }
 0x149   : > { %v381_v56 = vadd.f32 %v380_v30, %v378_v55  ;;  %v579_v60 = vadd.f32 %v578_v51, %v380_v30  ;;  %v851_v30 = vsub.s32 1, %v1641_v24 }
 0x14a   : > { %902 = vrot.lane.b32.xlu1 %v1689_v34, %s1390_s14 }
 0x14b   : > { %v390_v61 = vrot.slane %v381_v56, %v389_v12  ;;  %v386_v62 = vrot.slane %v381_v56, %v1651_v47  ;;  %v588_v1 = vrot.slane %v579_v60, %v389_v12  ;;  %v584_v3 = vrot.slane %v579_v60, %v1651_v47 }
 0x14c   : > { %v865_v33 = vrot.slane %v1220_v29, %v851_v30  ;;  %v1691_v35 = vrot.slane %v841_v32, %v851_v30 }
 0x14d   : > { %v394_v4 = vsel %vm393_vm12, %v390_v61, 0.0  ;;  %v608_v26 = vsel %vm607_vm13, %v386_v62, %v593_v63  ;;  %v591_v7 = vsel %vm590_vm14, %v588_v1, 0.0  ;;  %v603_v10 = vrot.slane %v584_v3, 5 }
 0x14e   : > { %v609_v8 = vsel %vm607_vm13, %v394_v4, %v594_v2  ;;  %v604_v11 = vrot.slane %v591_v7, 5  ;;  %v611_v14 = vsel %vm610_vm15, %v608_v26, %v598_v6  ;;  %916 = vrot.lane.b32.xlu0 %v865_v33, %s1389_s13  ;;  %vm870_vm13 = vcmask 15360  }
 0x14f   : > { %v612_v13 = vsel %vm610_vm15, %v609_v8, %v599_v5  ;;  %v614_v16 = vsel %vm613_vm2, %v611_v14, %v603_v10  ;;  %v1399_v10 = vmov 0   ;;  %v1026_v14 = vld [vmem:[%s1775_s7] sm:$0xf]  ;;  %vm1007_vm14 = vcmask 777216  }
 0x150   : > { %v615_v15 = vsel %vm613_vm2, %v612_v13, %v604_v11  ;;  %1314 = vset.pattern.permute.xlu1 %v1399_v10  ;;  %1315 = vset.pattern.permute.xlu0 %v1399_v10  ;;  %vm983_vm15 = vcmask 900096  }
 0x151   : > { %712 = vmatprep.mubr.f32.mxu0 %v615_v15 }
 0x152   : > { %713 = vmatmul.mubr.f32.vlgmr.msra.gmra.mxu0 %v614_v16  ;;  %904 = vrot.lane.b32.xlu0 %v1691_v35, %s1390_s14 }
 0x153   : > { %1100 = vmatprep.mubr.f32.mxu0 %v1388_v28 }
 0x1b8   : > { %v915_v45 = vpop.permute.xlu1 %914 }
 0x1bc   : > { %v903_v47 = vpop.permute.xlu1 %902 }
 0x1c0   : > { %v917_v46 = vpop.permute.xlu0 %916 }
 0x1c1   : > { %v919_v58 = vsel %vm918_vm7, %v915_v45, %v917_v46 }
 0x1c4   : > { %v905_v48 = vpop.permute.xlu0 %904 }
 0x1c5   : > { %v907_v61 = vsel %vm906_vm8, %v903_v47, %v905_v48 }
 0x212   : > { %v1258_v24 = vpop.f32.mrf.mxu0 }
 0x214   : > { %v1259_v12 = vpop.f32.mrf.mxu0 }
 0x215   : > { %v1260_v39 = vadd.f32 %v1259_v12, %v1258_v24 }
 0x217   : > { %v719_v40 = vmul.f32 %v1260_v39, %v718_v37 }
 0x219   : > { %817 = vmatmul.mubr.f32.vlgmr.msra.gmra.mxu1 %v719_v40 }
 0x2d9   : > { %v818_v42 = vpop.f32.mrf.mxu1 }
 0x2da   : > { %v826_v43 = vsel %vm825_vm3, %v818_v42, %v823_v41 }
 0x2db   : > { %v820_v9 = vpop.f32.mrf.mxu1  ;;  %830 = vrot.lane.b32.xlu1 %v826_v43, %s1391_s17 }
 0x2dc   : > { %v827_v44 = vsel %vm825_vm3, %v820_v9, %v1500_v0 }
 0x2dd   : > { %832 = vrot.lane.b32.xlu0 %v827_v44, %s1391_s17 }
 0x2df   : > { %890 = vrot.lane.b32.xlu1 %v861_v31, %s1392_s18 }
 0x2e1   : > { %892 = vrot.lane.b32.xlu0 %v865_v33, %s1392_s18 }
 0x2e3   : > { %878 = vrot.lane.b32.xlu1 %v1689_v34, %s1393_s19 }
 0x2e5   : > { %880 = vrot.lane.b32.xlu0 %v1691_v35, %s1393_s19 }
 0x2e7   : > { %866 = vrot.lane.b32.xlu1 %v861_v31, %s1394_s20 }
 0x2e9   : > { %868 = vrot.lane.b32.xlu0 %v865_v33, %s1394_s20 }
 0x34d   : > { %v831_v27 = vpop.permute.xlu1 %830 }
 0x34e   : > { %v1703_v38 = vsel %vm834_vm4, 0.0, %v831_v27 }
 0x34f   : > { %v833_v0 = vpop.permute.xlu0 %832  ;;  %964 = vrot.lane.b32.xlu1 %v1703_v38, %s1395_s22  ;;  %1001 = vrot.lane.b32.xlu0 %v1703_v38, %s1396_s23  ;;  %v923_v49 = vmul.f32 %v915_v45, %v1703_v38  ;;  %v911_v55 = vmul.f32 %v903_v47, %v1703_v38 }
 0x350   : > { %v1708_v50 = vsel %vm834_vm4, %v831_v27, %v833_v0  ;;  %v840_v21 = vsel %vm834_vm4, %v833_v0, 0.0 }
 0x351   : > { %v891_v52 = vpop.permute.xlu1 %890  ;;  %v925_v59 = vmul.f32 %v917_v46, %v840_v21  ;;  %v924_v60 = vmul.f32 %v919_v58, %v1708_v50  ;;  %v913_v63 = vmul.f32 %v905_v48, %v840_v21  ;;  %v912_v1 = vmul.f32 %v907_v61, %v1708_v50 }
 0x352   : > { %v899_v53 = vmul.f32 %v891_v52, %v1703_v38  ;;  %v855_v58 = vmul.f32 %v1689_v34, %v1703_v38 }
 0x353   : > { %1015 = vrot.lane.b32.xlu1 %v923_v49, %s1397_s24  ;;  %1003 = vrot.lane.b32.xlu0 %v1708_v50, %s1396_s23  ;;  %v893_v57 = vpop.permute.xlu0 %892 }
 0x354   : > { %v895_v2 = vsel %vm894_vm9, %v891_v52, %v893_v57  ;;  %v901_v4 = vmul.f32 %v893_v57, %v840_v21  ;;  %v856_v57 = vmul.f32 %v1691_v35, %v1708_v50 }
 0x355   : > { %v879_v54 = vpop.permute.xlu1 %878  ;;  %v900_v3 = vmul.f32 %v895_v2, %v1708_v50 }
 0x356   : > { %v887_v36 = vmul.f32 %v879_v54, %v1703_v38 }
 0x357   : > { %1005 = vrot.lane.b32.xlu1 %v840_v21, %s1396_s23  ;;  %977 = vrot.lane.b32.xlu0 %v899_v53, %s1398_s26  ;;  %v881_v62 = vpop.permute.xlu0 %880 }
 0x358   : > { %v883_v5 = vsel %vm882_vm11, %v879_v54, %v881_v62  ;;  %v889_v7 = vmul.f32 %v881_v62, %v840_v21 }
 0x359   : > { %v867_v51 = vpop.permute.xlu1 %866  ;;  %v888_v26 = vmul.f32 %v883_v5, %v1708_v50 }
 0x35a   : > { %v875_v56 = vmul.f32 %v867_v51, %v1703_v38 }
 0x35b   : > { %991 = vrot.lane.b32.xlu1 %v911_v55, %s1383_s10  ;;  %968 = vrot.lane.b32.xlu0 %v840_v21, %s1395_s22  ;;  %v869_v6 = vpop.permute.xlu0 %868 }
 0x35c   : > { %v871_v8 = vsel %vm870_vm13, %v867_v51, %v869_v6  ;;  %v877_v13 = vmul.f32 %v869_v6, %v840_v21 }
 0x35d   : > { %v876_v11 = vmul.f32 %v871_v8, %v1708_v50 }
 0x35f   : > { %966 = vrot.lane.b32.xlu1 %v1708_v50, %s1395_s22  ;;  %954 = vrot.lane.b32.xlu0 %v887_v36, %s1384_s11 }
 0x363   : > { %930 = vrot.lane.b32.xlu0 %v1708_v50, %s1378_s25  ;;  %941 = vrot.lane.b32.xlu1 %v875_v56, %s1380_s29 }
 0x367   : > { %1019 = vrot.lane.b32.xlu0 %v925_v59, %s1397_s24  ;;  %1017 = vrot.lane.b32.xlu1 %v924_v60, %s1397_s24  ;;  %v1025_v59 = vld [vmem:[%s1774_s6] sm:$0xf] }
 0x36b   : > { %995 = vrot.lane.b32.xlu0 %v913_v63, %s1383_s10  ;;  %993 = vrot.lane.b32.xlu1 %v912_v1, %s1383_s10 }
 0x36f   : > { %979 = vrot.lane.b32.xlu0 %v900_v3, %s1398_s26  ;;  %981 = vrot.lane.b32.xlu1 %v901_v4, %s1398_s26 }
 0x373   : > { %956 = vrot.lane.b32.xlu0 %v888_v26, %s1384_s11  ;;  %958 = vrot.lane.b32.xlu1 %v889_v7, %s1384_s11 }
 0x377   : > { %945 = vrot.lane.b32.xlu0 %v877_v13, %s1380_s29  ;;  %943 = vrot.lane.b32.xlu1 %v876_v11, %s1380_s29 }
 0x37b   : > { %928 = vrot.lane.b32.xlu0 %v1703_v38, %s1378_s25  ;;  %932 = vrot.lane.b32.xlu1 %v840_v21, %s1378_s25 }
 0x37f   : > { %1029 = vperm.xlu1 %1314, %v1026_v14  }
 0x3c1   : > { %v1002_v15 = vpop.permute.xlu0 %1001  ;;  %v965_v16 = vpop.permute.xlu1 %964 }
 0x3c5   : > { %v1004_v17 = vpop.permute.xlu0 %1003  ;;  %v1016_v18 = vpop.permute.xlu1 %1015 }
 0x3c6   : > { %v1008_v37 = vsel %vm1007_vm14, %v1002_v15, %v1004_v17 }
 0x3c9   : > { %v978_v19 = vpop.permute.xlu0 %977  ;;  %v1006_v20 = vpop.permute.xlu1 %1005 }
 0x3ca   : > { %v1009_v12 = vsel %vm1007_vm14, %v1004_v17, %v1006_v20 }
 0x3cd   : > { %v969_v22 = vpop.permute.xlu0 %968  ;;  %v992_v23 = vpop.permute.xlu1 %991 }
 0x3d1   : > { %v955_v25 = vpop.permute.xlu0 %954  ;;  %v967_v28 = vpop.permute.xlu1 %966 }
 0x3d2   : > { %v971_v46 = vsel %vm393_vm12, %v967_v28, %v969_v22  ;;  %v970_v47 = vsel %vm393_vm12, %v965_v16, %v967_v28 }
 0x3d5   : > { %v931_v29 = vpop.permute.xlu0 %930  ;;  %v942_v30 = vpop.permute.xlu1 %941 }
 0x3d9   : > { %v1020_v31 = vpop.permute.xlu0 %1019  ;;  %v1018_v32 = vpop.permute.xlu1 %1017 }
 0x3da   : > { %v1021_v33 = vsel %vm446_vm10, %v1016_v18, %v1018_v32  ;;  %v1022_v24 = vsel %vm446_vm10, %v1018_v32, %v1020_v31 }
 0x3db   : > { %1050 = vmatprep.subr.mxu0 %v1022_v24 }
 0x3dc   : > { %1051 = vmatpush1.msra.mxu0 %v1021_v33 }
 0x3dd   : > { %v996_v39 = vpop.permute.xlu0 %995  ;;  %1052 = vmatprep.subr.mxu0 %v1009_v12  ;;  %v994_v40 = vpop.permute.xlu1 %993 }
 0x3de   : > { %v997_v41 = vsel %vm412_vm6, %v992_v23, %v994_v40  ;;  %1053 = vmatpush1.msra.mxu0 %v1008_v37  ;;  %v998_v42 = vsel %vm412_vm6, %v994_v40, %v996_v39 }
 0x3df   : > { %1054 = vmatprep.subr.mxu0 %v998_v42 }
 0x3e0   : > { %1055 = vmatpush1.msra.mxu0 %v997_v41 }
 0x3e1   : > { %v980_v43 = vpop.permute.xlu0 %979  ;;  %v982_v9 = vpop.permute.xlu1 %981 }
 0x3e2   : > { %v984_v44 = vsel %vm983_vm15, %v978_v19, %v980_v43  ;;  %v985_v45 = vsel %vm983_vm15, %v980_v43, %v982_v9 }
 0x3e3   : > { %1056 = vmatprep.subr.mxu0 %v985_v45 }
 0x3e4   : > { %1057 = vmatpush1.msra.mxu0 %v984_v44 }
 0x3e5   : > { %v957_v48 = vpop.permute.xlu0 %956  ;;  %1058 = vmatprep.subr.mxu0 %v971_v46  ;;  %v959_v27 = vpop.permute.xlu1 %958 }
 0x3e6   : > { %v960_v0 = vsel %vm348_vm5, %v955_v25, %v957_v48  ;;  %1059 = vmatpush1.msra.mxu0 %v970_v47  ;;  %v961_v49 = vsel %vm348_vm5, %v957_v48, %v959_v27 }
 0x3e7   : > { %1060 = vmatprep.subr.mxu0 %v961_v49 }
 0x3e8   : > { %1061 = vmatpush1.msra.mxu0 %v960_v0 }
 0x3e9   : > { %v946_v52 = vpop.permute.xlu0 %945  ;;  %v944_v53 = vpop.permute.xlu1 %943 }
 0x3ea   : > { %v947_v21 = vsel %vm398_vm1, %v942_v30, %v944_v53  ;;  %v948_v54 = vsel %vm398_vm1, %v944_v53, %v946_v52  ;;  %vm1032_vm1 = vcmask 588800  }
 0x3eb   : > { %1062 = vmatprep.subr.mxu0 %v948_v54 }
 0x3ec   : > { %1063 = vmatpush1.msra.mxu0 %v947_v21 }
 0x3ed   : > { %v929_v55 = vpop.permute.xlu0 %928  ;;  %v933_v36 = vpop.permute.xlu1 %932 }
 0x3ee   : > { %v934_v51 = vsel %vm340_vm0, %v929_v55, %v931_v29  ;;  %v935_v56 = vsel %vm340_vm0, %v931_v29, %v933_v36 }
 0x3ef   : > { %1064 = vmatprep.subr.mxu0 %v935_v56 }
 0x3f0   : > { %1065 = vmatpush1.msra.mxu0 %v934_v51 }
 0x3f1   : > { %1066 = vmatprep.subr.mxu0 %v856_v57 }
 0x3f2   : > { %1067 = vmatpush1.msra.mxu0 %v855_v58 }
 0x3f3   : > { %1221 = vmatmul.mubr.msk.f32.vlgmr.msra.gmra.mxu0 %vm1032_vm1, %v1025_v59 }
 0x3fa   : > { %v1030_v61 = vpop.permute.xlu1 %1029 }
 0x4b3   : > { %v1102_v60 = vpop.f32.mrf.mxu0 }
 0x4b4   : > { %v1103_v63 = vadd.f32 %v1102_v60, %v1030_v61 }
 0x4b5   : > { %v1104_v62 = vpop.f32.mrf.mxu0 }
 0x4b6   : > { %v1105_v1 = vadd.f32 %v1104_v62, %v1030_v61 }
 0x4b8   : > { %v1109_v35 = vcombine.low %v1103_v63, %v1105_v1 }
 0x4ba   : > { %1111 = vst [vmem:[%s334_s12] sm:$0xff] %v1109_v35 }
 0x4bb PF: > { %s20_s27 = sadd.s32 1, %s1372_s27  }
 0x4bc   : > { %p17_p5 = scmp.ge.s32.totalorder %s20_s27, 4  }
 0x4be   :  { %19 = sbr.rel (!%p17_p5) target bundleno = 2 (0x2), region = 93 }
 0x4c3   :  { %1133 = vsyncpa [#allocation3], 1 }
 0x4c4   :  { %1135 = vsyncpa [#allocation3 + $0x1], 1 }
 0x4c5   :  { %1136 = vsyncpa [#allocation4], 1 }
 0x4c6   :  { %1138 = vsyncpa [#allocation4 + $0x1], 1 }

</bundles_post_ra>
